<compile_context>
chip_gen: v7x
topology: tpu7x:2x2x1
jax: 0.10.0
libtpu: 0.0.40
codegen_flags: <defaults>
</compile_context>

<pallas_src>
import functools

import jax
import jax.numpy as jnp
from jax.experimental import pallas as pl
from jax.experimental.pallas import tpu as pltpu


def _fused_graphsage_kernel(x_ref, adj_ref, w1_ref, b1_ref, *rest,
                            apply_dropout):
    if apply_dropout:
        mask_ref, w2_ref, b2_ref, o_ref = rest
    else:
        w2_ref, b2_ref, o_ref = rest

    cdt = w1_ref.dtype                     # compute dtype for MXU (f32 or bf16)

    adj = adj_ref[...]                     # (N, N)   compute dtype
    x = x_ref[...]                         # (N, Fin) compute dtype

    # --- degree normalization: computed once, shared by both layers --------
    deg = jnp.sum(adj.astype(jnp.float32), axis=-1, keepdims=True)     # (N, 1)
    inv_deg = 1.0 / jnp.maximum(deg, 1.0)                              # exact

    # --- layer 1: mean-aggregate + fused [agg | x] @ [W_rel ; W_root] ------
    agg1 = jnp.dot(adj, x, preferred_element_type=jnp.float32) * inv_deg
    cat1 = jnp.concatenate([agg1, x.astype(jnp.float32)], axis=-1)     # (N, 2Fin)
    h = jnp.dot(cat1.astype(cdt), w1_ref[...],
                preferred_element_type=jnp.float32)                    # (N, H)
    h = h + b1_ref[...]                                                # f32 bias
    h = jnp.maximum(h, 0.0)                                            # relu

    if apply_dropout:                      # mask holds 1/(1-p) or 0 (training)
        h = h * mask_ref[...]

    # --- layer 2 (h never leaves VMEM) --------------------------------------
    h_c = h.astype(cdt)
    agg2 = jnp.dot(adj, h_c, preferred_element_type=jnp.float32) * inv_deg
    cat2 = jnp.concatenate([agg2, h], axis=-1)                         # (N, 2H)
    out = jnp.dot(cat2.astype(cdt), w2_ref[...],
                  preferred_element_type=jnp.float32)                  # (N, Cpad)
    out = out + b2_ref[...]

    o_ref[...] = out.astype(o_ref.dtype)


def dense_graphsage_forward(x, adj, params, *, p=0.5, training=False,
                            dropout_key=None, compute_dtype=jnp.float32):
    """Matches DenseGraphSAGE.forward for a single dense graph (B == 1)."""
    N, f_in = x.shape
    hidden = params["w_rel1"].shape[1]
    num_classes = params["w_rel2"].shape[1]
    c_pad = max(128, -(-num_classes // 128) * 128)     # lane-dense output slab

    cdt = compute_dtype

    # Stack the two projections of each layer along the contraction axis so
    # the kernel does one wider-K matmul per layer.
    w1 = jnp.concatenate([params["w_rel1"], params["w_root1"]], axis=0).astype(cdt)
    w2 = jnp.concatenate([params["w_rel2"], params["w_root2"]], axis=0)
    w2 = jnp.pad(w2, ((0, 0), (0, c_pad - num_classes))).astype(cdt)
    b1 = params["b_rel1"].astype(jnp.float32)                           # (1, H)
    b2 = jnp.pad(params["b_rel2"],
                 ((0, 0), (0, c_pad - num_classes))).astype(jnp.float32)

    x_c = x.astype(cdt)
    adj_c = adj.astype(cdt)        # adj is 0/1 -> lossless in bf16

    apply_dropout = bool(training and p > 0.0)

    inputs = [x_c, adj_c, w1, b1]
    in_specs = [
        pl.BlockSpec((N, f_in), lambda i: (0, 0)),
        pl.BlockSpec((N, N), lambda i: (0, 0)),
        pl.BlockSpec((2 * f_in, hidden), lambda i: (0, 0)),
        pl.BlockSpec((1, hidden), lambda i: (0, 0)),
    ]
    if apply_dropout:
        keep = jax.random.bernoulli(dropout_key, 1.0 - p, (N, hidden))
        mask = keep.astype(jnp.float32) / (1.0 - p)
        inputs.append(mask)
        in_specs.append(pl.BlockSpec((N, hidden), lambda i: (0, 0)))
    inputs += [w2, b2]
    in_specs += [
        pl.BlockSpec((2 * hidden, c_pad), lambda i: (0, 0)),
        pl.BlockSpec((1, c_pad), lambda i: (0, 0)),
    ]

    flops = (2 * N * N * f_in + 2 * N * (2 * f_in) * hidden
             + 2 * N * N * hidden + 2 * N * (2 * hidden) * c_pad)
    bytes_accessed = (sum(int(a.size) * a.dtype.itemsize for a in inputs)
                      + N * c_pad * 4)
    cost = pl.CostEstimate(flops=flops, transcendentals=0,
                           bytes_accessed=bytes_accessed)

    kernel = functools.partial(_fused_graphsage_kernel,
                               apply_dropout=apply_dropout)

    out = pl.pallas_call(
        kernel,
        out_shape=jax.ShapeDtypeStruct((N, c_pad), jnp.float32),
        grid=(1,),
        in_specs=in_specs,
        out_specs=pl.BlockSpec((N, c_pad), lambda i: (0, 0)),
        compiler_params=pltpu.CompilerParams(
            dimension_semantics=("arbitrary",)),
        cost_estimate=cost,
    )(*inputs)

    # The torch module's reshape just drops the implicit batch dim; here we
    # additionally strip the lane padding.
    return out[:, :num_classes]


def init_params(key, num_features, hidden_channels, num_classes):
    """Deterministic glorot-uniform-ish init; weights stored as (F_in, F_out)."""
    ks = jax.random.split(key, 4)

    def glorot(k, fan_in, fan_out):
        lim = jnp.sqrt(6.0 / (fan_in + fan_out))
        return jax.random.uniform(k, (fan_in, fan_out), jnp.float32, -lim, lim)

    return {
        "w_rel1": glorot(ks[0], num_features, hidden_channels),
        "b_rel1": jnp.zeros((1, hidden_channels), jnp.float32),
        "w_root1": glorot(ks[1], num_features, hidden_channels),
        "w_rel2": glorot(ks[2], hidden_channels, num_classes),
        "b_rel2": jnp.zeros((1, num_classes), jnp.float32),
        "w_root2": glorot(ks[3], hidden_channels, num_classes),
    }


def _reference_forward(x, adj, params, compute_dtype=jnp.float32):
    """Pure-JAX eval-mode reference (same precision policy as the kernel)."""
    cdt = compute_dtype
    adj_c = adj.astype(cdt)
    inv_deg = 1.0 / jnp.maximum(adj.sum(-1, keepdims=True), 1.0)

    def conv(xi_f32, w_rel, b_rel, w_root):
        xi = xi_f32.astype(cdt)
        agg = jnp.dot(adj_c, xi, preferred_element_type=jnp.float32) * inv_deg
        return (jnp.dot(agg.astype(cdt), w_rel.astype(cdt),
                        preferred_element_type=jnp.float32)
                + b_rel
                + jnp.dot(xi, w_root.astype(cdt),
                          preferred_element_type=jnp.float32))

    h = jax.nn.relu(conv(x, params["w_rel1"], params["b_rel1"], params["w_root1"]))
    return conv(h, params["w_rel2"], params["b_rel2"], params["w_root2"])


if __name__ == "__main__":
    key = jax.random.PRNGKey(0)
    k_x, k_adj, k_params, k_drop = jax.random.split(key, 4)

    N = 64                # nodes
    num_features = 16
    hidden_channels = 32
    num_classes = 8

    x = jax.random.normal(k_x, (N, num_features), jnp.float32)

    # symmetric random 0/1 adjacency with self-loops removed
    a = (jax.random.uniform(k_adj, (N, N)) < 0.15).astype(jnp.float32)
    adj = jnp.maximum(a, a.T) * (1.0 - jnp.eye(N, dtype=jnp.float32))

    params = init_params(k_params, num_features, hidden_channels, num_classes)

    # --- f32 MXU path: strict check vs f32 reference -----------------------
    out_f32 = jax.block_until_ready(
        dense_graphsage_forward(x, adj, params, p=0.5, training=False,
                                compute_dtype=jnp.float32))
    ref_f32 = _reference_forward(x, adj, params, compute_dtype=jnp.float32)
    assert out_f32.shape == (N, num_classes)
    assert jnp.allclose(out_f32, ref_f32, atol=1e-4, rtol=1e-4), \
        "f32 kernel mismatch vs JAX reference"

    # --- bf16 MXU path (f32 accumulation): check vs same-precision ref -----
    out_bf16 = jax.block_until_ready(
        dense_graphsage_forward(x, adj, params, p=0.5, training=False,
                                compute_dtype=jnp.bfloat16))
    ref_bf16 = _reference_forward(x, adj, params, compute_dtype=jnp.bfloat16)
    assert out_bf16.shape == (N, num_classes)
    assert jnp.allclose(out_bf16, ref_bf16, atol=2e-3, rtol=2e-3), \
        "bf16 kernel mismatch vs matching-precision JAX reference"

    # --- training-mode path (dropout mask applied in-kernel): run coverage --
    out_train = jax.block_until_ready(
        dense_graphsage_forward(x, adj, params, p=0.5, training=True,
                                dropout_key=k_drop,
                                compute_dtype=jnp.bfloat16))
    assert out_train.shape == (N, num_classes)
    assert bool(jnp.all(jnp.isfinite(out_train)))

    print("KERNEL_OK")
</pallas_src>

<mosaic_0001>
module attributes {stable_mosaic.version = 11 : i64} {
  func.func @_fused_graphsage_kernel(%arg0: i32, %arg1: memref<64x16xf32, #tpu.memory_space<vmem>>, %arg2: memref<64x64xf32, #tpu.memory_space<vmem>>, %arg3: memref<32x32xf32, #tpu.memory_space<vmem>>, %arg4: memref<1x32xf32, #tpu.memory_space<vmem>>, %arg5: memref<64x128xf32, #tpu.memory_space<vmem>>, %arg6: memref<1x128xf32, #tpu.memory_space<vmem>>, %arg7: memref<64x128xf32, #tpu.memory_space<vmem>>) attributes {dimension_semantics = [#tpu.dimension_semantics<arbitrary>], iteration_bounds = array<i64: 1>, scalar_prefetch = 0 : i64, scratch_operands = 0 : i64, tpu.core_type = #tpu.core_type<tc>, window_params = [{pipeline_mode = #tpu.pipeline_mode<synchronous>, transform_indices = @transform_0, window_bounds = array<i64: 64, 16>}, {pipeline_mode = #tpu.pipeline_mode<synchronous>, transform_indices = @transform_1, window_bounds = array<i64: 64, 64>}, {pipeline_mode = #tpu.pipeline_mode<synchronous>, transform_indices = @transform_2, window_bounds = array<i64: 32, 32>}, {pipeline_mode = #tpu.pipeline_mode<synchronous>, transform_indices = @transform_3, window_bounds = array<i64: 1, 32>}, {pipeline_mode = #tpu.pipeline_mode<synchronous>, transform_indices = @transform_4, window_bounds = array<i64: 64, 128>}, {pipeline_mode = #tpu.pipeline_mode<synchronous>, transform_indices = @transform_5, window_bounds = array<i64: 1, 128>}, {pipeline_mode = #tpu.pipeline_mode<synchronous>, transform_indices = @transform_6, window_bounds = array<i64: 64, 128>}]} {
    %c0 = arith.constant 0 : index
    %c0_0 = arith.constant 0 : index
    %0 = vector.load %arg2[%c0, %c0_0] : memref<64x64xf32, #tpu.memory_space<vmem>>, vector<64x64xf32>
    %c0_1 = arith.constant 0 : index
    %c0_2 = arith.constant 0 : index
    %1 = vector.load %arg1[%c0_1, %c0_2] : memref<64x16xf32, #tpu.memory_space<vmem>>, vector<64x16xf32>
    %cst = arith.constant dense<0.000000e+00> : vector<64xf32>
    %2 = vector.multi_reduction <add>, %0, %cst [1] : vector<64x64xf32> to vector<64xf32>
    %3 = vector.shape_cast %2 : vector<64xf32> to vector<64x1xf32>
    %cst_3 = arith.constant 1.000000e+00 : f32
    %4 = vector.broadcast %cst_3 : f32 to vector<64x1xf32>
    %5 = arith.maximumf %3, %4 : vector<64x1xf32>
    %cst_4 = arith.constant 1.000000e+00 : f32
    %6 = vector.broadcast %cst_4 : f32 to vector<64x1xf32>
    %7 = arith.divf %6, %5 : vector<64x1xf32>
    %cst_5 = arith.constant dense<0.000000e+00> : vector<64x16xf32>
    %8 = tpu.matmul %0, %1, %cst_5 {dimension_numbers = #tpu.dot_dimension_numbers<[1], [0], [0], [1], [0, 0, 1, 1], [], []>} : vector<64x64xf32>, vector<64x16xf32>, vector<64x16xf32> -> vector<64x16xf32>
    %9 = vector.broadcast %7 : vector<64x1xf32> to vector<64x16xf32>
    %10 = arith.mulf %8, %9 : vector<64x16xf32>
    %11 = tpu.concatenate %10, %1 in 1 : vector<64x16xf32>, vector<64x16xf32> -> vector<64x32xf32>
    %c0_6 = arith.constant 0 : index
    %c0_7 = arith.constant 0 : index
    %12 = vector.load %arg3[%c0_6, %c0_7] : memref<32x32xf32, #tpu.memory_space<vmem>>, vector<32x32xf32>
    %cst_8 = arith.constant dense<0.000000e+00> : vector<64x32xf32>
    %13 = tpu.matmul %11, %12, %cst_8 {dimension_numbers = #tpu.dot_dimension_numbers<[1], [0], [0], [1], [0, 0, 1, 1], [], []>} : vector<64x32xf32>, vector<32x32xf32>, vector<64x32xf32> -> vector<64x32xf32>
    %c0_9 = arith.constant 0 : index
    %c0_10 = arith.constant 0 : index
    %14 = vector.load %arg4[%c0_9, %c0_10] : memref<1x32xf32, #tpu.memory_space<vmem>>, vector<1x32xf32>
    %15 = vector.broadcast %14 : vector<1x32xf32> to vector<64x32xf32>
    %16 = arith.addf %13, %15 : vector<64x32xf32>
    %cst_11 = arith.constant 0.000000e+00 : f32
    %17 = vector.broadcast %cst_11 : f32 to vector<64x32xf32>
    %18 = arith.maximumf %16, %17 : vector<64x32xf32>
    %cst_12 = arith.constant dense<0.000000e+00> : vector<64x32xf32>
    %19 = tpu.matmul %0, %18, %cst_12 {dimension_numbers = #tpu.dot_dimension_numbers<[1], [0], [0], [1], [0, 0, 1, 1], [], []>} : vector<64x64xf32>, vector<64x32xf32>, vector<64x32xf32> -> vector<64x32xf32>
    %20 = vector.broadcast %7 : vector<64x1xf32> to vector<64x32xf32>
    %21 = arith.mulf %19, %20 : vector<64x32xf32>
    %22 = tpu.concatenate %21, %18 in 1 : vector<64x32xf32>, vector<64x32xf32> -> vector<64x64xf32>
    %c0_13 = arith.constant 0 : index
    %c0_14 = arith.constant 0 : index
    %23 = vector.load %arg5[%c0_13, %c0_14] : memref<64x128xf32, #tpu.memory_space<vmem>>, vector<64x128xf32>
    %cst_15 = arith.constant dense<0.000000e+00> : vector<64x128xf32>
    %24 = tpu.matmul %22, %23, %cst_15 {dimension_numbers = #tpu.dot_dimension_numbers<[1], [0], [0], [1], [0, 0, 1, 1], [], []>} : vector<64x64xf32>, vector<64x128xf32>, vector<64x128xf32> -> vector<64x128xf32>
    %c0_16 = arith.constant 0 : index
    %c0_17 = arith.constant 0 : index
    %25 = vector.load %arg6[%c0_16, %c0_17] : memref<1x128xf32, #tpu.memory_space<vmem>>, vector<1x128xf32>
    %26 = vector.broadcast %25 : vector<1x128xf32> to vector<64x128xf32>
    %27 = arith.addf %24, %26 : vector<64x128xf32>
    %c0_18 = arith.constant 0 : index
    %c0_19 = arith.constant 0 : index
    %28 = vector.load %arg7[%c0_18, %c0_19] : memref<64x128xf32, #tpu.memory_space<vmem>>, vector<64x128xf32>
    tpu.vector_store %arg7[%c0_18, %c0_19], %27 {strides = array<i32>} : memref<64x128xf32, #tpu.memory_space<vmem>>, vector<64x128xf32>,
    return
  }
  func.func @transform_0(%arg0: i32) -> (i32, i32) {
    %c0_i32 = arith.constant 0 : i32
    %c0_i32_0 = arith.constant 0 : i32
    %c0_i32_1 = arith.constant 0 : i32
    return %c0_i32, %c0_i32_0 : i32, i32
  }
  func.func @transform_1(%arg0: i32) -> (i32, i32) {
    %c0_i32 = arith.constant 0 : i32
    %c0_i32_0 = arith.constant 0 : i32
    %c0_i32_1 = arith.constant 0 : i32
    return %c0_i32, %c0_i32_0 : i32, i32
  }
  func.func @transform_2(%arg0: i32) -> (i32, i32) {
    %c0_i32 = arith.constant 0 : i32
    %c0_i32_0 = arith.constant 0 : i32
    %c0_i32_1 = arith.constant 0 : i32
    return %c0_i32, %c0_i32_0 : i32, i32
  }
  func.func @transform_3(%arg0: i32) -> (i32, i32) {
    %c0_i32 = arith.constant 0 : i32
    %c0_i32_0 = arith.constant 0 : i32
    %c0_i32_1 = arith.constant 0 : i32
    return %c0_i32, %c0_i32_0 : i32, i32
  }
  func.func @transform_4(%arg0: i32) -> (i32, i32) {
    %c0_i32 = arith.constant 0 : i32
    %c0_i32_0 = arith.constant 0 : i32
    %c0_i32_1 = arith.constant 0 : i32
    return %c0_i32, %c0_i32_0 : i32, i32
  }
  func.func @transform_5(%arg0: i32) -> (i32, i32) {
    %c0_i32 = arith.constant 0 : i32
    %c0_i32_0 = arith.constant 0 : i32
    %c0_i32_1 = arith.constant 0 : i32
    return %c0_i32, %c0_i32_0 : i32, i32
  }
  func.func @transform_6(%arg0: i32) -> (i32, i32) {
    %c0_i32 = arith.constant 0 : i32
    %c0_i32_0 = arith.constant 0 : i32
    %c0_i32_1 = arith.constant 0 : i32
    return %c0_i32, %c0_i32_0 : i32, i32
  }
}

</mosaic_0001>

<bundles_post_ra>
// kernel: tpu_custom_call.1
= control target key start
LH: loop header
LB: loop body
LE: loop exit
PB: predicated region body
PF: predicated region fallthrough
CT: control target
= control target key end

     0   :  { %11 = vsyncpa [#allocation3], 0  ;;  %s1401_s0 = inlined_call_operand.vmem [shape: f32[64,16], index: 0, kind: input, shape index: {}]   ;;  %s1402_s1 = inlined_call_operand.vmem [shape: f32[64,64], index: 1, kind: input, shape index: {}]   ;;  %s1403_s2 = inlined_call_operand.hbm [shape: f32[32,32], index: 2, kind: input, shape index: {}]   ;;  %s1404_s3 = inlined_call_operand.vmem [shape: f32[1,32], index: 3, kind: input, shape index: {}]   ;;  %s1405_s4 = inlined_call_operand.hbm [shape: f32[64,128], index: 4, kind: input, shape index: {}]   ;;  %s1406_s5 = inlined_call_operand.vmem [shape: f32[1,128], index: 5, kind: input, shape index: {}]   ;;  %s1407_s6 = inlined_call_operand.hbm [shape: f32[64,128], index: 6, kind: output, shape index: {}]  }
   0x1   :  { %12 = vsyncpa [#allocation6], 0 }
   0x2   :  { %13 = vsyncpa [#allocation4], 0  ;;  %s1124_s21 = smov [#allocation2]   ;;  %s1052_s25 = scalar_lea.hbm %s1403_s2, 512 }
   0x3   :  { %s23_s22 = sshll.u32 %s1124_s21, 4  ;;  %p1053_p0 = scmp.ne.s32.totalorder %s1403_s2, %s1052_s25  ;;  %s24_s22 = int_to_ptr.vmem [resolvable:$true] %s23_s22 }
   0x4   :  { %p1056_p1 = scmp.lt.u32.totalorder %s1052_s25, %s1403_s2 }
   0x6   :  { %p1058_p2 = pnand %p1056_p1, %p1053_p0 }
   0x8   :  { %1061 = shalt.err (!%p1058_p2)
}
   0x9   :  { %s1062_s30 = scalar_lea.vmem %s24_s22, 512  ;;  %p1067_p4 = scmp.lt.s32.totalorder %s24_s22, %s24_s22 }
   0xa   :  { %p1063_p3 = scmp.ne.s32.totalorder %s24_s22, %s1062_s30  ;;  %p1068_p5 = scmp.lt.s32.totalorder %s1062_s30, %s1062_s30 }
   0xc   :  { %p1069_p6 = por %p1068_p5, %p1067_p4 }
   0xe   :  { %p1070_p7 = pnand %p1069_p6, %p1063_p3 }
  0x10   :  { %1073 = shalt.err (!%p1070_p7)
}
  0x11   :  { %s1125_s7 = smov 128   ;;  %s1126_s8 = smov 8  }
  0x12   :  { %29 = dma.hbm_to_vmem [thread:$0]  %s1403_s2, 512, %s24_s22, [#allocation3], %s1125_s7, %s1125_s7, %s1126_s8  }
  0x13   :  { %s1127_s11 = smov [#allocation5]   ;;  %s1074_s15 = scalar_lea.hbm %s1405_s4, 1024 }
  0x14   :  { %s37_s12 = sshll.u32 %s1127_s11, 4  ;;  %p1075_p8 = scmp.ne.s32.totalorder %s1405_s4, %s1074_s15  ;;  %s38_s12 = int_to_ptr.vmem [resolvable:$true] %s37_s12 }
  0x15   :  { %p1078_p9 = scmp.lt.u32.totalorder %s1074_s15, %s1405_s4 }
  0x17   :  { %p1080_p10 = pnand %p1078_p9, %p1075_p8 }
  0x19   :  { %1083 = shalt.err (!%p1080_p10)
}
  0x1a   :  { %s1084_s20 = scalar_lea.vmem %s38_s12, 1024  ;;  %p1089_p12 = scmp.lt.s32.totalorder %s38_s12, %s38_s12 }
  0x1b   :  { %p1085_p11 = scmp.ne.s32.totalorder %s38_s12, %s1084_s20  ;;  %p1090_p13 = scmp.lt.s32.totalorder %s1084_s20, %s1084_s20 }
  0x1d   :  { %p1091_p0 = por %p1090_p13, %p1089_p12 }
  0x1f   :  { %p1092_p1 = pnand %p1091_p0, %p1085_p11 }
  0x21   :  { %1095 = shalt.err (!%p1092_p1)
}
  0x22   :  { %43 = dma.hbm_to_vmem [thread:$0]  %s1405_s4, 1024, %s38_s12, [#allocation6], %s1125_s7, %s1125_s7, %s1126_s8  }
  0x23   :  { %1118 = dma.done.wait [#allocation3], 512  }
  0x24   :  { %1119 = vsyncadd [#allocation3], 4294966784 }
  0x25   :  { %1120 = dma.done.wait [#allocation6], 1024  }
  0x26   :  { %1121 = vsyncadd [#allocation6], 4294966272  ;;  %v60_v0 = vld [vmem:[%s1401_s0] sm:$0xff]  ;;  %v61_v1 = vld [vmem:[%s1401_s0 + $0x8] sm:$0xff]  ;;  %vm68_vm0 = vcmask 523264   ;;  %vm286_vm1 = vcmask 130048  }
  0x27   :  { %v62_v2 = vld [vmem:[%s1401_s0 + $0x10] sm:$0xff]  ;;  %v965_v3 = vpack.c.bf16 %v61_v1, %v60_v0  ;;  %v63_v4 = vld [vmem:[%s1401_s0 + $0x18] sm:$0xff]  ;;  %v64_v6 = vld [vmem:[%s1401_s0 + $0x20] sm:$0xff]  ;;  %vm306_vm2 = vcmask 261120   ;;  %s1129_s30 = smov 32   ;;  %s1130_s10 = smov [#allocation7]  }
  0x28   :  { %v969_v5 = vpack.c.bf16 %v63_v4, %v62_v2  ;;  %v65_v7 = vld [vmem:[%s1401_s0 + $0x28] sm:$0xff]  ;;  %v1217_v8 = vld [vmem:[%s1402_s1] sm:$0xff]  ;;  %v1224_v9 = vld [vmem:[%s1402_s1 + $0x10] sm:$0xff]  ;;  %s754_s11 = sshll.u32 %s1130_s10, 4  ;;  %s755_s11 = int_to_ptr.vmem [resolvable:$true] %s754_s11 }
  0x29   :  { %966 = vmatprep.subr.bf16.mxu0 %v965_v3  ;;  %877 = vmatprep.mubr.msk.f32.mxu0 %vm68_vm0, %v1217_v8  ;;  %v69_v10 = vsel %vm68_vm0, %v1217_v8, 0.0  ;;  %v1231_v11 = vld [vmem:[%s1402_s1 + $0x8] sm:$0xff]  ;;  %v75_v12 = vsel %vm68_vm0, %v1224_v9, 0.0  ;;  %v973_v13 = vpack.c.bf16 %v65_v7, %v64_v6  ;;  %v1238_v14 = vld [vmem:[%s1402_s1 + $0x18] sm:$0xff]  ;;  %v66_v16 = vld [vmem:[%s1401_s0 + $0x30] sm:$0xff]  ;;  %p1101_p3 = scmp.lt.s32.totalorder %s755_s11, %s755_s11 }
  0x2a   :  { %968 = vmatpush3.bf16.msra.mxu0 %v965_v3  ;;  %70 = vadd.xlane.f32.xlu0 %v69_v10  ;;  %v72_v15 = vsel %vm68_vm0, %v1231_v11, 0.0  ;;  %v67_v17 = vld [vmem:[%s1401_s0 + $0x38] sm:$0xff]  ;;  %v78_v18 = vsel %vm68_vm0, %v1238_v14, 0.0  ;;  %v1253_v19 = vld [vmem:[%s1402_s1 + $0x20] sm:$0xff]  ;;  %v1258_v21 = vld [vmem:[%s1402_s1 + $0x28] sm:$0xff] }
  0x2b   :  { %970 = vmatprep.subr.bf16.mxu0 %v969_v5  ;;  %76 = vadd.xlane.f32.xlu1 %v75_v12  ;;  %v977_v20 = vpack.c.bf16 %v67_v17, %v66_v16  ;;  %v81_v22 = vsel %vm68_vm0, %v1253_v19, 0.0  ;;  %v84_v23 = vsel %vm68_vm0, %v1258_v21, 0.0  ;;  %v1267_v24 = vld [vmem:[%s1402_s1 + $0x30] sm:$0xff]  ;;  %v1272_v25 = vld [vmem:[%s1402_s1 + $0x38] sm:$0xff]  ;;  %v295_v28 = vld [vmem:[#allocation2] sm:$0xff]  ;;  %s1128_s1 = smov 16  }
  0x2c   :  { %v87_v26 = vsel %vm68_vm0, %v1267_v24, 0.0  ;;  %v90_v27 = vsel %vm68_vm0, %v1272_v25, 0.0  ;;  %v296_v29 = vld [vmem:[#allocation2 + $0x8] sm:$0xff]  ;;  %v297_v31 = vld [vmem:[#allocation2 + $0x10] sm:$0xff]  ;;  %v298_v32 = vld [vmem:[#allocation2 + $0x18] sm:$0xff] }
  0x2d   :  { %v981_v30 = vpack.c.bf16 %v296_v29, %v295_v28  ;;  %v985_v33 = vpack.c.bf16 %v298_v32, %v297_v31 }
  0x2e   :  { %972 = vmatpush3.bf16.msra.mxu0 %v969_v5  ;;  %73 = vadd.xlane.f32.xlu0 %v72_v15 }
  0x2f   :  { %974 = vmatprep.subr.bf16.mxu0 %v973_v13  ;;  %79 = vadd.xlane.f32.xlu1 %v78_v18 }
  0x30   :  { %982 = vmatprep.subr.bf16.mxu1 %v981_v30 }
  0x31   :  { %984 = vmatpush3.bf16.msra.mxu1 %v981_v30 }
  0x32   :  { %976 = vmatpush3.bf16.msra.mxu0 %v973_v13  ;;  %82 = vadd.xlane.f32.xlu0 %v81_v22 }
  0x33   :  { %978 = vmatprep.subr.bf16.mxu0 %v977_v20  ;;  %85 = vadd.xlane.f32.xlu1 %v84_v23 }
  0x34   :  { %986 = vmatprep.subr.bf16.mxu1 %v985_v33 }
  0x35   :  { %988 = vmatpush3.bf16.msra.mxu1 %v985_v33 }
  0x36   :  { %980 = vmatpush3.bf16.msra.mxu0 %v977_v20  ;;  %88 = vadd.xlane.f32.xlu0 %v87_v26 }
  0x37   :  { %91 = vadd.xlane.f32.xlu1 %v90_v27 }
  0x39   :  { %878 = vmatmul.mubr.msk.f32.vlgmr.msra.gmra.mrb[0].mxu0 %vm68_vm0, %v1231_v11 }
  0x3a   :  { %880 = vmatprep.mubr.msk.f32.mxu0 %vm68_vm0, %v1224_v9 }
  0x3d   :  { %881 = vmatmul.mubr.msk.f32.gmra.mrb[2].mxu0 %vm68_vm0, %v1238_v14 }
  0x3e   :  { %883 = vmatprep.mubr.msk.f32.mxu0 %vm68_vm0, %v1253_v19 }
  0x41   :  { %884 = vmatmul.mubr.msk.f32.gmra.mrb[4].mxu0 %vm68_vm0, %v1258_v21 }
  0x42   :  { %886 = vmatprep.mubr.msk.f32.mxu0 %vm68_vm0, %v1267_v24 }
  0x45   :  { %887 = vmatmul.mubr.msk.f32.gmra.mrb[6].mxu0 %vm68_vm0, %v1272_v25 }
  0x48   :  { %264 = vrot.lane.b32.xlu1 %v61_v1, %s1128_s1 }
  0x4c   :  { %266 = vrot.lane.b32.xlu1 %v62_v2, %s1128_s1  ;;  %262 = vrot.lane.b32.xlu0 %v60_v0, %s1128_s1 }
  0x50   :  { %268 = vrot.lane.b32.xlu1 %v63_v4, %s1128_s1  ;;  %270 = vrot.lane.b32.xlu0 %v64_v6, %s1128_s1 }
  0x54   :  { %272 = vrot.lane.b32.xlu1 %v65_v7, %s1128_s1  ;;  %274 = vrot.lane.b32.xlu0 %v66_v16, %s1128_s1 }
  0x58   :  { %276 = vrot.lane.b32.xlu1 %v67_v17, %s1128_s1 }
  0xb7   :  { %v71_v36 = vpop.xlane.xlu0 %70 }
  0xb8   :  { %v77_v34 = vpop.xlane.xlu1 %76  ;;  %v93_v41 = vmax.f32 %v71_v36, 1.0 }
  0xb9   :  { %v95_v45 = vmax.f32 %v77_v34, 1.0  ;;  %v775_v34 = vld [vmem:[%s1404_s3] ss:$0 sm:$0xff] }
  0xbb   :  { %v74_v38 = vpop.xlane.xlu0 %73 }
  0xbc   :  { %v80_v35 = vpop.xlane.xlu1 %79  ;;  %v94_v39 = vmax.f32 %v74_v38, 1.0 }
  0xbd   :  { %v96_v43 = vmax.f32 %v80_v35, 1.0 }
  0xbe   :  { %1036 = vrcp.f32 %v94_v39 }
  0xbf   :  { %v83_v42 = vpop.xlane.xlu0 %82  ;;  %1038 = vrcp.f32 %v93_v41 }
  0xc0   :  { %v86_v37 = vpop.xlane.xlu1 %85  ;;  %v97_v46 = vmax.f32 %v83_v42, 1.0  ;;  %1040 = vrcp.f32 %v96_v43 }
  0xc1   :  { %v98_v47 = vmax.f32 %v86_v37, 1.0  ;;  %1042 = vrcp.f32 %v95_v45 }
  0xc2   :  { %1044 = vrcp.f32 %v97_v46 }
  0xc3   :  { %v89_v48 = vpop.xlane.xlu0 %88  ;;  %1046 = vrcp.f32 %v98_v47 }
  0xc4   :  { %v92_v40 = vpop.xlane.xlu1 %91  ;;  %v99_v50 = vmax.f32 %v89_v48, 1.0  ;;  %v597_v48 = vld [vmem:[#allocation5] sm:$0xff] }
  0xc5   :  { %v100_v52 = vmax.f32 %v92_v40, 1.0 }
  0xc6   :  { %1048 = vrcp.f32 %v99_v50  ;;  %v599_v50 = vld [vmem:[#allocation5 + $0x10] sm:$0xff] }
  0xc7   :  { %v263_v57 = vpop.permute.xlu0 %262  ;;  %1050 = vrcp.f32 %v100_v52 }
  0xc8   :  { %v265_v44 = vpop.permute.xlu1 %264  ;;  %v1292_v51 = vpop.eup %1036 }
  0xc9   :  { %v1294_v54 = vpop.eup %1038 }
  0xca   :  { %v1298_v60 = vpop.eup %1040 }
  0xcb   :  { %v1301_v63 = vpop.eup %1042  ;;  %v271_v5 = vpop.permute.xlu0 %270 }
  0xcc   :  { %v267_v49 = vpop.permute.xlu1 %266  ;;  %v1308_v4 = vpop.eup %1044 }
  0xcd   :  { %v1310_v6 = vpop.eup %1046 }
  0xcf   :  { %v275_v29 = vpop.permute.xlu0 %274 }
  0xd0   :  { %v269_v59 = vpop.permute.xlu1 %268  ;;  %v1318_v18 = vpop.eup %1048 }
  0xd1   :  { %v1320_v20 = vpop.eup %1050 }
  0xd4   :  { %v273_v12 = vpop.permute.xlu1 %272 }
  0xd8   :  { %v277_v31 = vpop.permute.xlu1 %276 }
 0x10c   :  { %v879_v53 = vpop.f32.mrb[0].mxu0 }
 0x10d   :  { %v247_v55 = vmul.f32 %v1292_v51, %v879_v53  ;;  %v207_v56 = vpop.f32.mrb[1].mxu0 }
 0x10e   :  { %v246_v58 = vmul.f32 %v1294_v54, %v207_v56  ;;  %v600_v56 = vld [vmem:[#allocation5 + $0x18] sm:$0xff] }
 0x10f   :  { %v288_v2 = vsel %vm286_vm1, %v247_v55, %v265_v44 }
 0x110   :  { %v882_v61 = vpop.f32.mrb[2].mxu0  ;;  %v287_v62 = vsel %vm286_vm1, %v246_v58, %v263_v57 }
 0x111   :  { %v249_v0 = vmul.f32 %v1298_v60, %v882_v61  ;;  %v217_v1 = vpop.f32.mrb[3].mxu0  ;;  %897 = vmatprep.mubr.msk.f32.mxu1 %vm306_vm2, %v287_v62  ;;  %v601_v61 = vld [vmem:[#allocation5 + $0x20] sm:$0xff]  ;;  %v602_v62 = vld [vmem:[#allocation5 + $0x28] sm:$0xff] }
 0x112   :  { %v248_v3 = vmul.f32 %v1301_v63, %v217_v1  ;;  %898 = vmatmul.mubr.msk.f32.vlgmr.msra.gmra.mrb[0].mxu1 %vm306_vm2, %v288_v2 }
 0x113   :  { %v290_v13 = vsel %vm286_vm1, %v249_v0, %v269_v59  ;;  %v1009_v59 = vpack.c.bf16 %v600_v56, %v599_v50 }
 0x114   :  { %v885_v7 = vpop.f32.mrb[4].mxu0  ;;  %v289_v10 = vsel %vm286_vm1, %v248_v3, %v267_v49  ;;  %v598_v49 = vld [vmem:[#allocation5 + $0x8] sm:$0xff] }
 0x115   :  { %v251_v15 = vmul.f32 %v1310_v6, %v885_v7  ;;  %v227_v16 = vpop.f32.mrb[5].mxu0  ;;  %900 = vmatprep.mubr.msk.f32.mxu1 %vm306_vm2, %v289_v10  ;;  %v1005_v55 = vpack.c.bf16 %v598_v49, %v597_v48  ;;  %v1013_v7 = vpack.c.bf16 %v602_v62, %v601_v61 }
 0x116   :  { %v250_v17 = vmul.f32 %v1308_v4, %v227_v16  ;;  %901 = vmatmul.mubr.msk.f32.gmra.mrb[2].mxu1 %vm306_vm2, %v290_v13 }
 0x117   :  { %v292_v26 = vsel %vm286_vm1, %v251_v15, %v273_v12  ;;  %1006 = vmatprep.subr.bf16.mxu0 %v1005_v55 }
 0x118   :  { %v291_v22 = vsel %vm286_vm1, %v250_v17, %v271_v5  ;;  %v888_v23 = vpop.f32.mrb[6].mxu0  ;;  %1008 = vmatpush3.bf16.msra.mxu0 %v1005_v55 }
 0x119   :  { %v253_v27 = vmul.f32 %v1320_v20, %v888_v23  ;;  %v237_v28 = vpop.f32.mrb[7].mxu0  ;;  %903 = vmatprep.mubr.msk.f32.mxu1 %vm306_vm2, %v291_v22  ;;  %1010 = vmatprep.subr.bf16.mxu0 %v1009_v59 }
 0x11a   :  { %v252_v30 = vmul.f32 %v1318_v18, %v237_v28  ;;  %904 = vmatmul.mubr.msk.f32.gmra.mrb[4].mxu1 %vm306_vm2, %v292_v26 }
 0x11b   :  { %v294_v33 = vsel %vm286_vm1, %v253_v27, %v277_v31 }
 0x11c   :  { %v293_v32 = vsel %vm286_vm1, %v252_v30, %v275_v29  ;;  %1012 = vmatpush3.bf16.msra.mxu0 %v1009_v59 }
 0x11d   :  { %906 = vmatprep.mubr.msk.f32.mxu1 %vm306_vm2, %v293_v32  ;;  %1014 = vmatprep.subr.bf16.mxu0 %v1013_v7 }
 0x11e   :  { %907 = vmatmul.mubr.msk.f32.gmra.mrb[6].mxu1 %vm306_vm2, %v294_v33 }
 0x11f   :  { %925 = vmatprep.mubr.msk.f32.mxu1 %vm68_vm0, %v1217_v8 }
 0x120   :  { %1016 = vmatpush3.bf16.msra.mxu0 %v1013_v7 }
 0x1e5   :  { %v899_v35 = vpop.f32.mrb[0].mxu1 }
 0x1e6   :  { %v403_v36 = vadd.f32 %v899_v35, %v775_v34  ;;  %v397_v37 = vpop.f32.mrb[1].mxu1 }
 0x1e7   :  { %v398_v38 = vadd.f32 %v775_v34, %v397_v37 }
 0x1e8   :  { %v437_v39 = vmax.f32 %v403_v36, 0.0 }
 0x1e9   :  { %v436_v40 = vmax.f32 %v398_v38, 0.0  ;;  %v902_v41 = vpop.f32.mrb[2].mxu1 }
 0x1ea   :  { %v413_v42 = vadd.f32 %v902_v41, %v775_v34  ;;  %567 = vrot.lane.b32.xlu1 %v437_v39, %s1129_s30  ;;  %v407_v43 = vpop.f32.mrb[3].mxu1 }
 0x1eb   :  { %v989_v44 = vpack.c.bf16 %v437_v39, %v436_v40  ;;  %v408_v45 = vadd.f32 %v775_v34, %v407_v43  ;;  %565 = vrot.lane.b32.xlu0 %v436_v40, %s1129_s30 }
 0x1ec   :  { %v439_v8 = vmax.f32 %v413_v42, 0.0 }
 0x1ed   :  { %v438_v46 = vmax.f32 %v408_v45, 0.0  ;;  %v905_v47 = vpop.f32.mrb[4].mxu1  ;;  %990 = vmatprep.subr.bf16.mxu1 %v989_v44 }
 0x1ee   :  { %v423_v52 = vadd.f32 %v905_v47, %v775_v34  ;;  %571 = vrot.lane.b32.xlu1 %v439_v8, %s1129_s30  ;;  %v417_v53 = vpop.f32.mrb[5].mxu1  ;;  %992 = vmatpush3.bf16.msra.mxu1 %v989_v44 }
 0x1ef   :  { %v993_v57 = vpack.c.bf16 %v439_v8, %v438_v46  ;;  %v418_v58 = vadd.f32 %v775_v34, %v417_v53  ;;  %569 = vrot.lane.b32.xlu0 %v438_v46, %s1129_s30 }
 0x1f0   :  { %v441_v0 = vmax.f32 %v423_v52, 0.0 }
 0x1f1   :  { %v440_v1 = vmax.f32 %v418_v58, 0.0  ;;  %v908_v2 = vpop.f32.mrb[6].mxu1  ;;  %994 = vmatprep.subr.bf16.mxu1 %v993_v57 }
 0x1f2   :  { %v433_v3 = vadd.f32 %v908_v2, %v775_v34  ;;  %v427_v5 = vpop.f32.mrb[7].mxu1  ;;  %996 = vmatpush3.bf16.msra.mxu1 %v993_v57 }
 0x1f3   :  { %v997_v10 = vpack.c.bf16 %v441_v0, %v440_v1  ;;  %v428_v12 = vadd.f32 %v775_v34, %v427_v5  ;;  %573 = vrot.lane.b32.xlu0 %v440_v1, %s1129_s30 }
 0x1f4   :  { %v443_v13 = vmax.f32 %v433_v3, 0.0 }
 0x1f5   :  { %v442_v15 = vmax.f32 %v428_v12, 0.0  ;;  %998 = vmatprep.subr.bf16.mxu1 %v997_v10 }
 0x1f6   :  { %1000 = vmatpush3.bf16.msra.mxu1 %v997_v10 }
 0x1f7   :  { %v1001_v16 = vpack.c.bf16 %v443_v13, %v442_v15  ;;  %575 = vrot.lane.b32.xlu0 %v441_v0, %s1129_s30  ;;  %577 = vrot.lane.b32.xlu1 %v442_v15, %s1129_s30 }
 0x1f9   :  { %1002 = vmatprep.subr.bf16.mxu1 %v1001_v16 }
 0x1fa   :  { %1004 = vmatpush3.bf16.msra.mxu1 %v1001_v16 }
 0x1fb   :  { %579 = vrot.lane.b32.xlu1 %v443_v13, %s1129_s30  ;;  %1021 = vmatprep.subr.bf16.mxu1 %v1005_v55 }
 0x1fd   :  { %926 = vmatmul.mubr.msk.f32.vlgmr.msra.gmra.mrb[8].mxu1 %vm68_vm0, %v1231_v11  ;;  %v604_v11 = vld [vmem:[#allocation5 + $0x38] sm:$0xff] }
 0x1fe   :  { %928 = vmatprep.mubr.msk.f32.mxu1 %vm68_vm0, %v1224_v9  ;;  %1025 = vmatpush3.bf16.msra.mxu1 %v1005_v55  ;;  %v603_v9 = vld [vmem:[#allocation5 + $0x30] sm:$0xff] }
 0x1ff   :  { %1022 = vmatprep.subr.bf16.mxu1 %v1009_v59  ;;  %v1017_v17 = vpack.c.bf16 %v604_v11, %v603_v9 }
 0x201   :  { %929 = vmatmul.mubr.msk.f32.gmra.mrb[10].mxu1 %vm68_vm0, %v1238_v14  ;;  %1018 = vmatprep.subr.bf16.mxu0 %v1017_v17 }
 0x202   :  { %931 = vmatprep.mubr.msk.f32.mxu1 %vm68_vm0, %v1253_v19  ;;  %1026 = vmatpush3.bf16.msra.mxu1 %v1009_v59 }
 0x203   :  { %1023 = vmatprep.subr.bf16.mxu1 %v1013_v7  ;;  %1020 = vmatpush3.bf16.msra.mxu0 %v1017_v17 }
 0x205   :  { %932 = vmatmul.mubr.msk.f32.gmra.mrb[12].mxu1 %vm68_vm0, %v1258_v21 }
 0x206   :  { %934 = vmatprep.mubr.msk.f32.mxu1 %vm68_vm0, %v1267_v24  ;;  %1027 = vmatpush3.bf16.msra.mxu1 %v1013_v7 }
 0x207   :  { %1024 = vmatprep.subr.bf16.mxu1 %v1017_v17 }
 0x209   :  { %935 = vmatmul.mubr.msk.f32.gmra.mrb[14].mxu1 %vm68_vm0, %v1272_v25 }
 0x20a   :  { %1028 = vmatpush3.bf16.msra.mxu1 %v1017_v17 }
 0x25c   :  { %v568_v19 = vpop.permute.xlu1 %567 }
 0x25d   :  { %v566_v14 = vpop.permute.xlu0 %565 }
 0x260   :  { %v572_v31 = vpop.permute.xlu1 %571 }
 0x261   :  { %v570_v22 = vpop.permute.xlu0 %569 }
 0x265   :  { %v574_v32 = vpop.permute.xlu0 %573 }
 0x269   :  { %v576_v38 = vpop.permute.xlu0 %575 }
 0x2d0   :  { %v927_v23 = vpop.f32.mrb[8].mxu1 }
 0x2d1   :  { %v550_v21 = vmul.f32 %v1292_v51, %v927_v23  ;;  %v510_v26 = vpop.f32.mrb[9].mxu1 }
 0x2d2   :  { %v549_v24 = vmul.f32 %v1294_v54, %v510_v26 }
 0x2d3   :  { %v590_v25 = vsel %vm306_vm2, %v550_v21, %v568_v19 }
 0x2d4   :  { %v930_v27 = vpop.f32.mrb[10].mxu1  ;;  %v589_v28 = vsel %vm306_vm2, %v549_v24, %v566_v14 }
 0x2d5   :  { %v552_v29 = vmul.f32 %v1298_v60, %v930_v27  ;;  %v520_v30 = vpop.f32.mrb[11].mxu1  ;;  %953 = vmatprep.mubr.msk.f32.mxu0 %vm68_vm0, %v589_v28  ;;  %v578_v60 = vpop.permute.xlu1 %577 }
 0x2d6   :  { %v551_v33 = vmul.f32 %v1301_v63, %v520_v30  ;;  %954 = vmatmul.mubr.msk.f32.vlgmr.msra.gmra.mrb[8].mxu0 %vm68_vm0, %v590_v25 }
 0x2d7   :  { %v592_v36 = vsel %vm306_vm2, %v552_v29, %v572_v31 }
 0x2d8   :  { %v933_v51 = vpop.f32.mrb[12].mxu1  ;;  %v591_v34 = vsel %vm306_vm2, %v551_v33, %v570_v22 }
 0x2d9   :  { %v554_v54 = vmul.f32 %v1310_v6, %v933_v51  ;;  %v530_v35 = vpop.f32.mrb[13].mxu1  ;;  %956 = vmatprep.mubr.msk.f32.mxu0 %vm68_vm0, %v591_v34  ;;  %v580_v43 = vpop.permute.xlu1 %579 }
 0x2da   :  { %v553_v37 = vmul.f32 %v1308_v4, %v530_v35  ;;  %957 = vmatmul.mubr.msk.f32.gmra.mrb[10].mxu0 %vm68_vm0, %v592_v36 }
 0x2db   :  { %v594_v6 = vsel %vm306_vm2, %v554_v54, %v576_v38 }
 0x2dc   :  { %v936_v39 = vpop.f32.mrb[14].mxu1  ;;  %v593_v63 = vsel %vm306_vm2, %v553_v37, %v574_v32 }
 0x2dd   :  { %v556_v40 = vmul.f32 %v1320_v20, %v936_v39  ;;  %v540_v41 = vpop.f32.mrb[15].mxu1  ;;  %959 = vmatprep.mubr.msk.f32.mxu0 %vm68_vm0, %v593_v63  ;;  %v792_v20 = vld [vmem:[%s1406_s5] ss:$0 sm:$0xff]  ;;  %s1096_s5 = scalar_lea.vmem %s755_s11, 1024 }
 0x2de   :  { %v555_v42 = vmul.f32 %v1318_v18, %v540_v41  ;;  %960 = vmatmul.mubr.msk.f32.gmra.mrb[12].mxu0 %vm68_vm0, %v594_v6  ;;  %p1097_p2 = scmp.ne.s32.totalorder %s755_s11, %s1096_s5  ;;  %p1102_p4 = scmp.lt.s32.totalorder %s1096_s5, %s1096_s5 }
 0x2df   :  { %v596_v44 = vsel %vm306_vm2, %v556_v40, %v580_v43 }
 0x2e0   :  { %v595_v4 = vsel %vm306_vm2, %v555_v42, %v578_v60  ;;  %p1103_p5 = por %p1102_p4, %p1101_p3 }
 0x2e1   :  { %962 = vmatprep.mubr.msk.f32.mxu1 %vm68_vm0, %v595_v4 }
 0x2e2   :  { %963 = vmatmul.mubr.msk.f32.vlgmr.msra.gmra.mrb[16].mxu1 %vm68_vm0, %v596_v44  ;;  %p1104_p6 = pnand %p1103_p5, %p1097_p2 }
 0x3a9   :  { %v955_v45 = vpop.f32.mrb[8].mxu0 }
 0x3aa   :  { %v708_v8 = vadd.f32 %v955_v45, %v792_v20  ;;  %v702_v46 = vpop.f32.mrb[9].mxu0 }
 0x3ab   :  { %v703_v47 = vadd.f32 %v792_v20, %v702_v46 }
 0x3ac   :  { %742 = vst [vmem:[#allocation7 + $0x8] sm:$0xff] %v708_v8 }
 0x3ad   :  { %741 = vst [vmem:[#allocation7] sm:$0xff] %v703_v47  ;;  %v958_v18 = vpop.f32.mrb[10].mxu0 }
 0x3ae   :  { %v718_v48 = vadd.f32 %v958_v18, %v792_v20  ;;  %v712_v49 = vpop.f32.mrb[11].mxu0 }
 0x3af   :  { %v713_v50 = vadd.f32 %v792_v20, %v712_v49 }
 0x3b0   :  { %744 = vst [vmem:[#allocation7 + $0x18] sm:$0xff] %v718_v48 }
 0x3b1   :  { %743 = vst [vmem:[#allocation7 + $0x10] sm:$0xff] %v713_v50  ;;  %v961_v52 = vpop.f32.mrb[12].mxu0 }
 0x3b2   :  { %v728_v53 = vadd.f32 %v961_v52, %v792_v20  ;;  %v722_v55 = vpop.f32.mrb[13].mxu0 }
 0x3b3   :  { %v723_v56 = vadd.f32 %v792_v20, %v722_v55 }
 0x3b4   :  { %746 = vst [vmem:[#allocation7 + $0x28] sm:$0xff] %v728_v53 }
 0x3b5   :  { %745 = vst [vmem:[#allocation7 + $0x20] sm:$0xff] %v723_v56  ;;  %v964_v57 = vpop.f32.mrb[16].mxu1 }
 0x3b6   :  { %v738_v58 = vadd.f32 %v964_v57, %v792_v20  ;;  %v732_v59 = vpop.f32.mrb[17].mxu1 }
 0x3b7   :  { %v733_v61 = vadd.f32 %v792_v20, %v732_v59 }
 0x3b8   :  { %748 = vst [vmem:[#allocation7 + $0x38] sm:$0xff] %v738_v58 }
 0x3b9   :  { %747 = vst [vmem:[#allocation7 + $0x30] sm:$0xff] %v733_v61 }
 0x3ba   :  { %1107 = shalt.err (!%p1104_p6)
}
 0x3bb   :  { %s1108_s14 = scalar_lea.hbm %s1407_s6, 1024 }
 0x3bc   :  { %p1109_p7 = scmp.ne.s32.totalorder %s1407_s6, %s1108_s14  ;;  %p1112_p8 = scmp.lt.u32.totalorder %s1108_s14, %s1407_s6 }
 0x3be   :  { %p1114_p9 = pnand %p1112_p8, %p1109_p7 }
 0x3c0   :  { %1117 = shalt.err (!%p1114_p9)
}
 0x3c1   :  { %760 = dma.vmem_to_hbm [thread:$0]  %s755_s11, 1024, %s1407_s6, [#allocation4], %s1125_s7, %s1125_s7, %s1126_s8  }
 0x3c2   :  { %1122 = dma.done.wait [#allocation4], 1024  }
 0x3c3   :  { %1123 = vsyncadd [#allocation4], 4294966272 }
 0x3c4   :  { %764 = vsyncpa [#allocation3], 1 }
 0x3c5   :  { %765 = vsyncpa [#allocation6], 1 }
 0x3c6   :  { %766 = vsyncpa [#allocation4], 1 }

</bundles_post_ra>
